<compile_context>
chip_gen: v7x
topology: tpu7x:2x2x1
jax: 0.10.0
libtpu: 0.0.40
codegen_flags: <defaults>
</compile_context>

<pallas_src>
import functools

import jax
import jax.numpy as jnp
import numpy as np
from jax.experimental import pallas as pl
from jax.experimental.pallas import tpu as pltpu

KH = KW = 3       # conv kernel size (Options.kernel_size)
PAD = 1           # Options.padding
PK = 2            # Options.maxpool_kernel (stride defaults to kernel)
BN_EPS = 1e-5     # nn.BatchNorm2d default eps


def _conv_bn_relu_pool_kernel(lhs_ref, tw_ref, gb_ref, out_ref, *,
                              cout, n_samples, n_count):
    """Fused Conv2d(3x3, p=1) + BatchNorm(batch stats) + ReLU + MaxPool(2, 2).

    lhs_ref: (KH, M, LP) bf16  per-dh LHS slabs; row r = (q*N + n)*HO + ho holds
                               padded input row 2*ho + q + dh of sample n,
                               lanes = w*Cin + ci, zero-padded to LP
    tw_ref : (KH, LP, OL) bf16 block-Toeplitz conv weights; OL lanes = (w%2, w//2, co)
    gb_ref : (2, OL)      f32  row 0 = gamma, row 1 = beta, lane-tiled period cout
    out_ref: (HO, N*OL//2) f32 pooled output; lanes = (n, wo, co)
    """
    M = lhs_ref.shape[1]                  # 2 * N * HO
    OL = tw_ref.shape[2]
    HALF = OL // 2
    HO = M // (2 * n_samples)
    f32 = jnp.float32

    # ---- Conv: KH batched block-Toeplitz matmuls, bf16 operands, f32 acc ----
    # Weight-stationary: each (LP, OL) RHS is loaded and consumed by exactly
    # one (M, LP) x (LP, OL) matmul, so at most one RHS is live at a time.
    acc = jnp.dot(lhs_ref[0], tw_ref[0], preferred_element_type=f32)
    for dh in range(1, KH):
        acc = acc + jnp.dot(lhs_ref[dh], tw_ref[dh], preferred_element_type=f32)

    # ---- Fused BatchNorm statistics (sum / sum-of-squares) ------------------
    # Fold the M rows into HO rows with sublane-aligned VALU adds so the XLU
    # roll-tree below operates on a full (8, 128)-shaped value.
    s1 = acc[:HO]
    s2 = acc[:HO] * acc[:HO]
    for blk in range(1, M // HO):
        piece = acc[blk * HO:(blk + 1) * HO]
        s1 = s1 + piece
        s2 = s2 + piece * piece
    # Reduce over the OL//cout lane groups (and broadcast back in place) with
    # an XLU roll log-tree: afterwards every lane holds its channel's total.
    sh = cout
    while sh < OL:
        s1 = s1 + pltpu.roll(s1, shift=sh, axis=1)
        s2 = s2 + pltpu.roll(s2, shift=sh, axis=1)
        sh *= 2
    tot1 = jnp.sum(s1, axis=0, keepdims=True)       # (1, OL) per-channel totals
    tot2 = jnp.sum(s2, axis=0, keepdims=True)
    inv_n = 1.0 / float(n_count)
    mean = tot1 * inv_n
    var = tot2 * inv_n - mean * mean                # biased variance (BN default)
    scale = gb_ref[0:1, :] * jax.lax.rsqrt(var + BN_EPS)
    shift = gb_ref[1:2, :] - mean * scale
    # (Conv bias omitted on purpose: with batch-statistics BN it cancels.)

    # ---- BN affine + ReLU + 2x2/2 max-pool (single normalize expression) ----
    y = jnp.maximum(acc * scale + shift, 0.0)       # scale/shift broadcast once
    half_m = M // 2
    hm = jnp.maximum(y[:half_m], y[half_m:])        # pool over H pairs (row parity)
    pooled = jnp.maximum(hm[:, :HALF], hm[:, HALF:])  # pool over W pairs (lane parity)
    # Dropout(p=0.0) is the identity.
    # Relayout (N*HO, HALF) -> lane-dense (HO, N*HALF) and do one unmasked store.
    pieces = [pooled[n * HO:(n + 1) * HO, :] for n in range(n_samples)]
    out_ref[...] = jnp.concatenate(pieces, axis=1)


def prepare_conv_block_params(conv_w_oihw, bn_gamma, bn_beta, h, w):
    """One-time weight transform.  Depends only on conv_w / BN params and the
    input spatial size -- cache the result across calls with the same weights."""
    Cout, Cin = conv_w_oihw.shape[0], conv_w_oihw.shape[1]
    Hp, Wp = h + 2 * PAD, w + 2 * PAD
    Wc = Wp - KW + 1
    WO = (Wc - PK) // PK + 1
    LP = -(-(Wp * Cin) // 128) * 128                 # input lanes, padded to 128
    OL = PK * WO * Cout                              # output lanes = (parity, wo, co)

    # conv weight -> KH block-Toeplitz matrices, output-lane order (p, wo, co)
    sel = np.zeros((KW, Wp, Wc), np.float32)
    for dw in range(KW):
        for ww in range(Wc):
            sel[dw, ww + dw, ww] = 1.0
    w_khwc = jnp.transpose(conv_w_oihw, (2, 3, 1, 0)).astype(jnp.float32)  # (KH,KW,Cin,Cout)
    toep = jnp.einsum('dxw,kdio->kxiwo', jnp.asarray(sel), w_khwc)         # (KH,Wp,Cin,Wc,Cout)
    toep = toep.reshape(KH, Wp * Cin, WO, PK, Cout)                        # w = wo*2 + p
    toep = jnp.transpose(toep, (0, 1, 3, 2, 4)).reshape(KH, Wp * Cin, OL)  # lanes=(p,wo,co)
    toep = jnp.pad(toep, ((0, 0), (0, LP - Wp * Cin), (0, 0)))
    toep = toep.astype(jnp.bfloat16)                 # bf16 MXU operand

    # BN affine params, packed and lane-tiled to match the output lane layout
    gb = jnp.stack([jnp.tile(bn_gamma.astype(jnp.float32), PK * WO),
                    jnp.tile(bn_beta.astype(jnp.float32), PK * WO)])       # (2, OL)
    return toep, gb


def conv_block_apply(x_nchw, toep_bf16, gb):
    """Forward pass given prepared (cached) Toeplitz weights / BN params."""
    N, Cin, H, W = x_nchw.shape
    Hp, Wp = H + 2 * PAD, W + 2 * PAD
    Hc, Wc = Hp - KH + 1, Wp - KW + 1                  # conv output (stride 1)
    HO, WO = (Hc - PK) // PK + 1, (Wc - PK) // PK + 1  # pooled output
    assert Hc == PK * HO and Wc == PK * WO, \
        "kernel assumes the 2x2 pool tiles the conv output exactly"
    assert (PK * WO) & (PK * WO - 1) == 0, \
        "roll-based BN reduction needs a power-of-two lane-group count"

    LP = toep_bf16.shape[1]
    OL = toep_bf16.shape[2]
    Cout = OL // (PK * WO)

    # ---- input: NCHW -> (N, Hp, Wp*Cin), zero pad lanes to LP ---------------
    xf = jnp.transpose(x_nchw, (0, 2, 3, 1)).astype(jnp.float32)       # NHWC
    xf = jnp.pad(xf, ((0, 0), (PAD, PAD), (PAD, PAD), (0, 0)))
    xf = xf.reshape(N, Hp, Wp * Cin)
    xf = jnp.pad(xf, ((0, 0), (0, 0), (0, LP - Wp * Cin)))

    # ---- per-dh LHS slabs: row (q*N + n)*HO + ho = padded row 2*ho+q+dh of n
    slabs = []
    for dh in range(KH):
        per_q = [xf[:, q + dh: q + dh + PK * HO: PK, :] for q in range(PK)]
        slabs.append(jnp.stack(per_q, axis=0).reshape(PK * N * HO, LP))
    lhs = jnp.stack(slabs, axis=0).astype(jnp.bfloat16)                # (KH, 2N*HO, LP)

    kernel = functools.partial(_conv_bn_relu_pool_kernel,
                               cout=Cout, n_samples=N, n_count=N * Hc * Wc)
    vmem = pl.BlockSpec(memory_space=pltpu.MemorySpace.VMEM)
    out = pl.pallas_call(
        kernel,
        out_shape=jax.ShapeDtypeStruct((HO, N * WO * Cout), jnp.float32),
        in_specs=[vmem, vmem, vmem],
        out_specs=vmem,
    )(lhs, toep_bf16, gb)

    # (HO, N*WO*Cout) -> NCHW.  If this block is stacked, prefer to keep the
    # lane-dense layout between blocks instead of round-tripping through NCHW.
    return jnp.transpose(out.reshape(HO, N, WO, Cout), (1, 3, 0, 2))


@jax.jit
def conv_block_forward(x_nchw, conv_w_oihw, conv_b, bn_gamma, bn_beta):
    """conv_block_base forward for NCHW input; returns NCHW output.

    conv_b is accepted for API parity but unused: with batch-statistics BN
    (track_running_stats=False) the conv bias cancels exactly.
    """
    del conv_b
    toep, gb = prepare_conv_block_params(conv_w_oihw, bn_gamma, bn_beta,
                                         x_nchw.shape[2], x_nchw.shape[3])
    return conv_block_apply(x_nchw, toep, gb)


def _reference(x_nchw, conv_w, conv_b, bn_gamma, bn_beta):
    """Pure-JAX reference mirroring the PyTorch module semantics."""
    y = jax.lax.conv_general_dilated(
        x_nchw.astype(jnp.float32), conv_w.astype(jnp.float32),
        window_strides=(1, 1), padding=((PAD, PAD), (PAD, PAD)),
        dimension_numbers=('NCHW', 'OIHW', 'NCHW'),
        precision=jax.lax.Precision.HIGHEST)
    y = y + conv_b[None, :, None, None]
    mean = jnp.mean(y, axis=(0, 2, 3), keepdims=True)
    var = jnp.mean((y - mean) ** 2, axis=(0, 2, 3), keepdims=True)
    y = (y - mean) / jnp.sqrt(var + BN_EPS)
    y = y * bn_gamma[None, :, None, None] + bn_beta[None, :, None, None]
    y = jnp.maximum(y, 0.0)
    y = jax.lax.reduce_window(y, -jnp.inf, jax.lax.max,
                              (1, 1, PK, PK), (1, 1, PK, PK), 'VALID')
    return y


if __name__ == "__main__":
    # Shapes consistent with the module: conv_block_base(4, 8, 16)
    N, Cin, Cout, H, W = 2, 4, 8, 16, 16

    key = jax.random.PRNGKey(0)
    kx, kw, kb, kg, kbe = jax.random.split(key, 5)
    x = jax.random.normal(kx, (N, Cin, H, W), jnp.float32)
    conv_w = 0.2 * jax.random.normal(kw, (Cout, Cin, KH, KW), jnp.float32)
    conv_b = 0.1 * jax.random.normal(kb, (Cout,), jnp.float32)
    bn_gamma = 1.0 + 0.1 * jax.random.normal(kg, (Cout,), jnp.float32)
    bn_beta = 0.1 * jax.random.normal(kbe, (Cout,), jnp.float32)

    out = jax.block_until_ready(
        conv_block_forward(x, conv_w, conv_b, bn_gamma, bn_beta))
    ref = jax.block_until_ready(
        _reference(x, conv_w, conv_b, bn_gamma, bn_beta))

    assert out.shape == (N, Cout, H // PK, W // PK), out.shape
    # Tolerance leaves headroom for the bf16 MXU operands (K_eff = 12 MACs per
    # output) vs the HIGHEST-precision XLA reference; genuine bugs show at O(1).
    max_err = float(jnp.max(jnp.abs(out - ref)))
    assert jnp.allclose(out, ref, rtol=2e-2, atol=2e-2), max_err
    print("KERNEL_OK")
</pallas_src>

<mosaic_0001>
module attributes {stable_mosaic.version = 11 : i64} {
  func.func @_conv_bn_relu_pool_kernel(%arg0: memref<3x32x128xbf16, #tpu.memory_space<vmem>>, %arg1: memref<3x128x128xbf16, #tpu.memory_space<vmem>>, %arg2: memref<2x128xf32, #tpu.memory_space<vmem>>, %arg3: memref<8x128xf32, #tpu.memory_space<vmem>>) attributes {dimension_semantics = [], scalar_prefetch = 0 : i64, scratch_operands = 0 : i64, tpu.core_type = #tpu.core_type<tc>} {
    %c0 = arith.constant 0 : index
    %c0_0 = arith.constant 0 : index
    %c0_1 = arith.constant 0 : index
    %0 = vector.load %arg0[%c0, %c0_0, %c0_1] : memref<3x32x128xbf16, #tpu.memory_space<vmem>>, vector<1x32x128xbf16>
    %1 = vector.shape_cast %0 : vector<1x32x128xbf16> to vector<32x128xbf16>
    %c0_2 = arith.constant 0 : index
    %c0_3 = arith.constant 0 : index
    %c0_4 = arith.constant 0 : index
    %2 = vector.load %arg1[%c0_2, %c0_3, %c0_4] : memref<3x128x128xbf16, #tpu.memory_space<vmem>>, vector<1x128x128xbf16>
    %3 = vector.shape_cast %2 : vector<1x128x128xbf16> to vector<128x128xbf16>
    %cst = arith.constant dense<0.000000e+00> : vector<32x128xf32>
    %4 = tpu.matmul %1, %3, %cst {dimension_numbers = #tpu.dot_dimension_numbers<[1], [0], [0], [1], [0, 0, 1, 1], [], []>} : vector<32x128xbf16>, vector<128x128xbf16>, vector<32x128xf32> -> vector<32x128xf32>
    %c1 = arith.constant 1 : index
    %c0_5 = arith.constant 0 : index
    %c0_6 = arith.constant 0 : index
    %5 = vector.load %arg0[%c1, %c0_5, %c0_6] : memref<3x32x128xbf16, #tpu.memory_space<vmem>>, vector<1x32x128xbf16>
    %6 = vector.shape_cast %5 : vector<1x32x128xbf16> to vector<32x128xbf16>
    %c1_7 = arith.constant 1 : index
    %c0_8 = arith.constant 0 : index
    %c0_9 = arith.constant 0 : index
    %7 = vector.load %arg1[%c1_7, %c0_8, %c0_9] : memref<3x128x128xbf16, #tpu.memory_space<vmem>>, vector<1x128x128xbf16>
    %8 = vector.shape_cast %7 : vector<1x128x128xbf16> to vector<128x128xbf16>
    %cst_10 = arith.constant dense<0.000000e+00> : vector<32x128xf32>
    %9 = tpu.matmul %6, %8, %cst_10 {dimension_numbers = #tpu.dot_dimension_numbers<[1], [0], [0], [1], [0, 0, 1, 1], [], []>} : vector<32x128xbf16>, vector<128x128xbf16>, vector<32x128xf32> -> vector<32x128xf32>
    %10 = arith.addf %4, %9 : vector<32x128xf32>
    %c2 = arith.constant 2 : index
    %c0_11 = arith.constant 0 : index
    %c0_12 = arith.constant 0 : index
    %11 = vector.load %arg0[%c2, %c0_11, %c0_12] : memref<3x32x128xbf16, #tpu.memory_space<vmem>>, vector<1x32x128xbf16>
    %12 = vector.shape_cast %11 : vector<1x32x128xbf16> to vector<32x128xbf16>
    %c2_13 = arith.constant 2 : index
    %c0_14 = arith.constant 0 : index
    %c0_15 = arith.constant 0 : index
    %13 = vector.load %arg1[%c2_13, %c0_14, %c0_15] : memref<3x128x128xbf16, #tpu.memory_space<vmem>>, vector<1x128x128xbf16>
    %14 = vector.shape_cast %13 : vector<1x128x128xbf16> to vector<128x128xbf16>
    %cst_16 = arith.constant dense<0.000000e+00> : vector<32x128xf32>
    %15 = tpu.matmul %12, %14, %cst_16 {dimension_numbers = #tpu.dot_dimension_numbers<[1], [0], [0], [1], [0, 0, 1, 1], [], []>} : vector<32x128xbf16>, vector<128x128xbf16>, vector<32x128xf32> -> vector<32x128xf32>
    %16 = arith.addf %10, %15 : vector<32x128xf32>
    %17 = vector.extract_strided_slice %16 {offsets = [0, 0], sizes = [8, 128], strides = [1, 1]} : vector<32x128xf32> to vector<8x128xf32>
    %18 = vector.extract_strided_slice %16 {offsets = [0, 0], sizes = [8, 128], strides = [1, 1]} : vector<32x128xf32> to vector<8x128xf32>
    %19 = vector.extract_strided_slice %16 {offsets = [0, 0], sizes = [8, 128], strides = [1, 1]} : vector<32x128xf32> to vector<8x128xf32>
    %20 = arith.mulf %18, %19 : vector<8x128xf32>
    %21 = vector.extract_strided_slice %16 {offsets = [8, 0], sizes = [8, 128], strides = [1, 1]} : vector<32x128xf32> to vector<8x128xf32>
    %22 = arith.addf %17, %21 : vector<8x128xf32>
    %23 = arith.mulf %21, %21 : vector<8x128xf32>
    %24 = arith.addf %20, %23 : vector<8x128xf32>
    %25 = vector.extract_strided_slice %16 {offsets = [16, 0], sizes = [8, 128], strides = [1, 1]} : vector<32x128xf32> to vector<8x128xf32>
    %26 = arith.addf %22, %25 : vector<8x128xf32>
    %27 = arith.mulf %25, %25 : vector<8x128xf32>
    %28 = arith.addf %24, %27 : vector<8x128xf32>
    %29 = vector.extract_strided_slice %16 {offsets = [24, 0], sizes = [8, 128], strides = [1, 1]} : vector<32x128xf32> to vector<8x128xf32>
    %30 = arith.addf %26, %29 : vector<8x128xf32>
    %31 = arith.mulf %29, %29 : vector<8x128xf32>
    %32 = arith.addf %28, %31 : vector<8x128xf32>
    %c8_i32 = arith.constant 8 : i32
    %33 = tpu.dynamic_rotate %30 by %c8_i32 dim 1 : vector<8x128xf32>, i32 -> vector<8x128xf32>
    %34 = arith.addf %30, %33 : vector<8x128xf32>
    %c8_i32_17 = arith.constant 8 : i32
    %35 = tpu.dynamic_rotate %32 by %c8_i32_17 dim 1 : vector<8x128xf32>, i32 -> vector<8x128xf32>
    %36 = arith.addf %32, %35 : vector<8x128xf32>
    %c16_i32 = arith.constant 16 : i32
    %37 = tpu.dynamic_rotate %34 by %c16_i32 dim 1 : vector<8x128xf32>, i32 -> vector<8x128xf32>
    %38 = arith.addf %34, %37 : vector<8x128xf32>
    %c16_i32_18 = arith.constant 16 : i32
    %39 = tpu.dynamic_rotate %36 by %c16_i32_18 dim 1 : vector<8x128xf32>, i32 -> vector<8x128xf32>
    %40 = arith.addf %36, %39 : vector<8x128xf32>
    %c32_i32 = arith.constant 32 : i32
    %41 = tpu.dynamic_rotate %38 by %c32_i32 dim 1 : vector<8x128xf32>, i32 -> vector<8x128xf32>
    %42 = arith.addf %38, %41 : vector<8x128xf32>
    %c32_i32_19 = arith.constant 32 : i32
    %43 = tpu.dynamic_rotate %40 by %c32_i32_19 dim 1 : vector<8x128xf32>, i32 -> vector<8x128xf32>
    %44 = arith.addf %40, %43 : vector<8x128xf32>
    %c64_i32 = arith.constant 64 : i32
    %45 = tpu.dynamic_rotate %42 by %c64_i32 dim 1 : vector<8x128xf32>, i32 -> vector<8x128xf32>
    %46 = arith.addf %42, %45 : vector<8x128xf32>
    %c64_i32_20 = arith.constant 64 : i32
    %47 = tpu.dynamic_rotate %44 by %c64_i32_20 dim 1 : vector<8x128xf32>, i32 -> vector<8x128xf32>
    %48 = arith.addf %44, %47 : vector<8x128xf32>
    %cst_21 = arith.constant dense<0.000000e+00> : vector<128xf32>
    %49 = vector.multi_reduction <add>, %46, %cst_21 [0] : vector<8x128xf32> to vector<128xf32>
    %50 = vector.shape_cast %49 : vector<128xf32> to vector<1x128xf32>
    %cst_22 = arith.constant dense<0.000000e+00> : vector<128xf32>
    %51 = vector.multi_reduction <add>, %48, %cst_22 [0] : vector<8x128xf32> to vector<128xf32>
    %52 = vector.shape_cast %51 : vector<128xf32> to vector<1x128xf32>
    %cst_23 = arith.constant 0.001953125 : f32
    %53 = vector.broadcast %cst_23 : f32 to vector<1x128xf32>
    %54 = arith.mulf %50, %53 : vector<1x128xf32>
    %cst_24 = arith.constant 0.001953125 : f32
    %55 = vector.broadcast %cst_24 : f32 to vector<1x128xf32>
    %56 = arith.mulf %52, %55 : vector<1x128xf32>
    %57 = arith.mulf %54, %54 : vector<1x128xf32>
    %58 = arith.subf %56, %57 : vector<1x128xf32>
    %c0_25 = arith.constant 0 : index
    %c0_26 = arith.constant 0 : index
    %59 = vector.load %arg2[%c0_25, %c0_26] : memref<2x128xf32, #tpu.memory_space<vmem>>, vector<1x128xf32>
    %cst_27 = arith.constant 9.99999974E-6 : f32
    %60 = vector.broadcast %cst_27 : f32 to vector<1x128xf32>
    %61 = arith.addf %58, %60 : vector<1x128xf32>
    %62 = math.rsqrt %61 : vector<1x128xf32>
    %63 = arith.mulf %59, %62 : vector<1x128xf32>
    %c1_28 = arith.constant 1 : index
    %c0_29 = arith.constant 0 : index
    %64 = vector.load %arg2[%c1_28, %c0_29] : memref<2x128xf32, #tpu.memory_space<vmem>>, vector<1x128xf32>
    %65 = arith.mulf %54, %63 : vector<1x128xf32>
    %66 = arith.subf %64, %65 : vector<1x128xf32>
    %67 = vector.broadcast %63 : vector<1x128xf32> to vector<32x128xf32>
    %68 = arith.mulf %16, %67 : vector<32x128xf32>
    %69 = vector.broadcast %66 : vector<1x128xf32> to vector<32x128xf32>
    %70 = arith.addf %68, %69 : vector<32x128xf32>
    %cst_30 = arith.constant 0.000000e+00 : f32
    %71 = vector.broadcast %cst_30 : f32 to vector<32x128xf32>
    %72 = arith.maximumf %70, %71 : vector<32x128xf32>
    %73 = vector.extract_strided_slice %72 {offsets = [0, 0], sizes = [16, 128], strides = [1, 1]} : vector<32x128xf32> to vector<16x128xf32>
    %74 = vector.extract_strided_slice %72 {offsets = [16, 0], sizes = [16, 128], strides = [1, 1]} : vector<32x128xf32> to vector<16x128xf32>
    %75 = arith.maximumf %73, %74 : vector<16x128xf32>
    %76 = vector.extract_strided_slice %75 {offsets = [0, 0], sizes = [16, 64], strides = [1, 1]} : vector<16x128xf32> to vector<16x64xf32>
    %77 = vector.extract_strided_slice %75 {offsets = [0, 64], sizes = [16, 64], strides = [1, 1]} : vector<16x128xf32> to vector<16x64xf32>
    %78 = arith.maximumf %76, %77 : vector<16x64xf32>
    %79 = vector.extract_strided_slice %78 {offsets = [0, 0], sizes = [8, 64], strides = [1, 1]} : vector<16x64xf32> to vector<8x64xf32>
    %80 = vector.extract_strided_slice %78 {offsets = [8, 0], sizes = [8, 64], strides = [1, 1]} : vector<16x64xf32> to vector<8x64xf32>
    %81 = tpu.concatenate %79, %80 in 1 : vector<8x64xf32>, vector<8x64xf32> -> vector<8x128xf32>
    %c0_31 = arith.constant 0 : index
    %c0_32 = arith.constant 0 : index
    %82 = vector.load %arg3[%c0_31, %c0_32] : memref<8x128xf32, #tpu.memory_space<vmem>>, vector<8x128xf32>
    tpu.vector_store %arg3[%c0_31, %c0_32], %81 {strides = array<i32>} : memref<8x128xf32, #tpu.memory_space<vmem>>, vector<8x128xf32>,
    return
  }
}

</mosaic_0001>

<bundles_post_ra>
// kernel: tile.13
= control target key start
LH: loop header
LB: loop body
LE: loop exit
PB: predicated region body
PF: predicated region fallthrough
CT: control target
= control target key end

     0   :  { %s28_s0 = inlined_call_operand.vmem [shape: f32[8], index: 0, kind: input, shape index: {}]   ;;  %s29_s1 = inlined_call_operand.vmem [shape: f32[16,8], index: 1, kind: output, shape index: {}]  }
   0x1   :  { %v4_v0 = vld [vmem:[%s28_s0] ss:$0 sm:$0xff] }
   0x2   :  { %5 = vst [vmem:[%s29_s1] sm:$0xff] %v4_v0  ;;  %8 = vst [vmem:[%s29_s1 + $0x8] sm:$0xff] %v4_v0 }

// kernel: tile.18
= control target key start
LH: loop header
LB: loop body
LE: loop exit
PB: predicated region body
PF: predicated region fallthrough
CT: control target
= control target key end

     0   :  { %s131_s10 = smov 120   ;;  %s132_s11 = smov 104   ;;  %vm3_vm0 = vcmask 64512   ;;  %vm9_vm1 = vcmask 1048512   ;;  %vm15_vm2 = vcmask 982912   ;;  %vm21_vm3 = vcmask 917312   ;;  %s207_s0 = inlined_call_operand.vmem [shape: f32[16,8], index: 0, kind: input, shape index: {}]   ;;  %s208_s1 = inlined_call_operand.vmem [shape: f32[1,128], index: 1, kind: output, shape index: {}]  }
   0x1   :  { %v101_v0 = vld [vmem:[%s207_s0 + $0xf] sm:$0x1]   ;;  %v103_v1 = vld [vmem:[%s207_s0 + $0xd] sm:$0x1]   ;;  %v102_v2 = vld [vmem:[%s207_s0 + $0xe] sm:$0x1]  }
   0x2   :  { %7 = vrot.lane.b32.xlu0 %v101_v0, %s131_s10  ;;  %19 = vrot.lane.b32.xlu1 %v103_v1, %s132_s11  ;;  %v104_v3 = vld [vmem:[%s207_s0 + $0xc] sm:$0x1]   ;;  %s133_s16 = smov 112   ;;  %s134_s17 = smov 96   ;;  %v105_v4 = vld [vmem:[%s207_s0 + $0xb] sm:$0x1]  }
   0x3   :  { %v106_v5 = vld [vmem:[%s207_s0 + $0xa] sm:$0x1]   ;;  %v2_v6 = vld [vmem:[%s207_s0] sm:$0x1]   ;;  %s135_s24 = smov 88   ;;  %s136_s25 = smov 80  }
   0x4   :  { %4 = vst.msk [vmem:[#allocation0] sm:$0x1] %vm3_vm0, %v2_v6   ;;  %v107_v7 = vld [vmem:[%s207_s0 + $0x9] sm:$0x1]   ;;  %v108_v8 = vld [vmem:[%s207_s0 + $0x8] sm:$0x1]  }
   0x5   :  { %s137_s30 = smov 72   ;;  %s138_s2 = smov 64   ;;  %v109_v9 = vld [vmem:[%s207_s0 + $0x7] sm:$0x1]   ;;  %v110_v10 = vld [vmem:[%s207_s0 + $0x6] sm:$0x1]  }
   0x6   :  { %13 = vrot.lane.b32.xlu0 %v102_v2, %s133_s16  ;;  %25 = vrot.lane.b32.xlu1 %v104_v3, %s134_s17  ;;  %s139_s7 = smov 56   ;;  %s140_s8 = smov 48   ;;  %v111_v11 = vld [vmem:[%s207_s0 + $0x5] sm:$0x1]   ;;  %v112_v12 = vld [vmem:[%s207_s0 + $0x4] sm:$0x1]  }
   0x7   :  { %s141_s13 = smov 40   ;;  %s142_s14 = smov 32   ;;  %v113_v13 = vld [vmem:[%s207_s0 + $0x3] sm:$0x1]   ;;  %v114_v14 = vld [vmem:[%s207_s0 + $0x2] sm:$0x1]  }
   0x8   :  { %s143_s19 = smov 24   ;;  %s144_s20 = smov 16   ;;  %v115_v15 = vld [vmem:[%s207_s0 + $0x1] sm:$0x1]   ;;  %vm27_vm4 = vcmask 851712   ;;  %vm33_vm5 = vcmask 786112  }
   0x9   :  { %s145_s0 = smov 8   ;;  %vm39_vm6 = vcmask 720512   ;;  %vm45_vm7 = vcmask 654912   ;;  %vm51_vm8 = vcmask 589312   ;;  %vm57_vm9 = vcmask 523712  }
   0xa   :  { %31 = vrot.lane.b32.xlu0 %v105_v4, %s135_s24  ;;  %37 = vrot.lane.b32.xlu1 %v106_v5, %s136_s25  ;;  %vm63_vm10 = vcmask 458112   ;;  %vm69_vm11 = vcmask 392512   ;;  %vm75_vm12 = vcmask 326912   ;;  %vm81_vm13 = vcmask 261312  }
   0xb   :  { %vm87_vm14 = vcmask 195712   ;;  %vm93_vm15 = vcmask 130112  }
   0xe   :  { %43 = vrot.lane.b32.xlu0 %v107_v7, %s137_s30  ;;  %49 = vrot.lane.b32.xlu1 %v108_v8, %s138_s2 }
  0x12   :  { %55 = vrot.lane.b32.xlu0 %v109_v9, %s139_s7  ;;  %61 = vrot.lane.b32.xlu1 %v110_v10, %s140_s8 }
  0x16   :  { %67 = vrot.lane.b32.xlu0 %v111_v11, %s141_s13  ;;  %73 = vrot.lane.b32.xlu1 %v112_v12, %s142_s14 }
  0x1a   :  { %79 = vrot.lane.b32.xlu0 %v113_v13, %s143_s19  ;;  %85 = vrot.lane.b32.xlu1 %v114_v14, %s144_s20 }
  0x1e   :  { %91 = vrot.lane.b32.xlu0 %v115_v15, %s145_s0 }
  0x74   :  { %v8_v16 = vpop.permute.xlu0 %7   ;;  %v20_v17 = vpop.permute.xlu1 %19  }
  0x75   :  { %10 = vst.msk [vmem:[#allocation0] sm:$0x1] %vm9_vm1, %v8_v16  }
  0x78   :  { %v14_v18 = vpop.permute.xlu0 %13   ;;  %v26_v19 = vpop.permute.xlu1 %25  }
  0x79   :  { %16 = vst.msk [vmem:[#allocation0] sm:$0x1] %vm15_vm2, %v14_v18  }
  0x7a   :  { %22 = vst.msk [vmem:[#allocation0] sm:$0x1] %vm21_vm3, %v20_v17  }
  0x7b   :  { %28 = vst.msk [vmem:[#allocation0] sm:$0x1] %vm27_vm4, %v26_v19  }
  0x7c   :  { %v32_v20 = vpop.permute.xlu0 %31   ;;  %v38_v21 = vpop.permute.xlu1 %37  }
  0x7d   :  { %34 = vst.msk [vmem:[#allocation0] sm:$0x1] %vm33_vm5, %v32_v20  }
  0x7e   :  { %40 = vst.msk [vmem:[#allocation0] sm:$0x1] %vm39_vm6, %v38_v21  }
  0x80   :  { %v44_v22 = vpop.permute.xlu0 %43   ;;  %v50_v23 = vpop.permute.xlu1 %49  }
  0x81   :  { %46 = vst.msk [vmem:[#allocation0] sm:$0x1] %vm45_vm7, %v44_v22  }
  0x82   :  { %52 = vst.msk [vmem:[#allocation0] sm:$0x1] %vm51_vm8, %v50_v23  }
  0x84   :  { %v56_v24 = vpop.permute.xlu0 %55   ;;  %v62_v25 = vpop.permute.xlu1 %61  }
  0x85   :  { %58 = vst.msk [vmem:[#allocation0] sm:$0x1] %vm57_vm9, %v56_v24  }
  0x86   :  { %64 = vst.msk [vmem:[#allocation0] sm:$0x1] %vm63_vm10, %v62_v25  }
  0x88   :  { %v68_v26 = vpop.permute.xlu0 %67   ;;  %v74_v27 = vpop.permute.xlu1 %73  }
  0x89   :  { %70 = vst.msk [vmem:[#allocation0] sm:$0x1] %vm69_vm11, %v68_v26  }
  0x8a   :  { %76 = vst.msk [vmem:[#allocation0] sm:$0x1] %vm75_vm12, %v74_v27  }
  0x8c   :  { %v80_v28 = vpop.permute.xlu0 %79   ;;  %v86_v29 = vpop.permute.xlu1 %85  }
  0x8d   :  { %82 = vst.msk [vmem:[#allocation0] sm:$0x1] %vm81_vm13, %v80_v28  }
  0x8e   :  { %88 = vst.msk [vmem:[#allocation0] sm:$0x1] %vm87_vm14, %v86_v29  }
  0x90   :  { %v92_v30 = vpop.permute.xlu0 %91  }
  0x91   :  { %94 = vst.msk [vmem:[#allocation0] sm:$0x1] %vm93_vm15, %v92_v30  }
  0x98   :  { %v98_v31 = vld [vmem:[#allocation0] sm:$0x1] }
  0x99   :  { %100 = vst [vmem:[%s208_s1] sm:$0x1] %v98_v31 }

// kernel: conv_block_forward.1
= control target key start
LH: loop header
LB: loop body
LE: loop exit
PB: predicated region body
PF: predicated region fallthrough
CT: control target
= control target key end

     0   :  { %s716_s18 = smov 32   ;;  %s717_s19 = smov 64   ;;  %vm503_vm0 = vcmask 523264   ;;  %s866_s1 = inlined_call_operand.vmem [shape: bf16[3,128,128], index: 1, kind: input, shape index: {}]   ;;  %s867_s0 = inlined_call_operand.vmem [shape: bf16[3,32,128], index: 0, kind: input, shape index: {}]   ;;  %s868_s2 = inlined_call_operand.vmem [shape: f32[2,128], index: 2, kind: input, shape index: {}]   ;;  %s869_s3 = inlined_call_operand.vmem [shape: f32[8,128], index: 3, kind: output, shape index: {}]  }
   0x1   :  { %v682_v0 = vld [vmem:[%s866_s1] sm:$0xff]   ;;  %v683_v1 = vld [vmem:[%s866_s1 + $0x8] sm:$0xff]   ;;  %v684_v2 = vld [vmem:[%s866_s1 + $0x10] sm:$0xff]  }
   0x2   :  { %630 = vmatprep.subr.bf16.mxu0 %v682_v0  ;;  %v685_v3 = vld [vmem:[%s866_s1 + $0x18] sm:$0xff]   ;;  %v690_v4 = vld [vmem:[%s866_s1 + $0x40] sm:$0xff]   ;;  %v693_v6 = vld [vmem:[%s866_s1 + $0x48] sm:$0xff]  }
   0x3   :  { %631 = vmatpush3.bf16.msra.mxu0 %v682_v0  ;;  %v691_v5 = vld [vmem:[%s867_s0] sm:$0xff]   ;;  %610 = vmatprep.subr.bf16.mxu1 %v690_v4  ;;  %v696_v8 = vld [vmem:[%s866_s1 + $0x50] sm:$0xff]   ;;  %v687_v9 = vld [vmem:[%s866_s1 + $0x28] sm:$0xff]  }
   0x4   :  { %632 = vmatprep.subr.bf16.mxu0 %v683_v1  ;;  %611 = vmatpush3.bf16.msra.mxu1 %v690_v4  ;;  %v686_v7 = vld [vmem:[%s866_s1 + $0x20] sm:$0xff]   ;;  %v698_v10 = vld [vmem:[%s866_s1 + $0x58] sm:$0xff]   ;;  %v688_v11 = vld [vmem:[%s866_s1 + $0x30] sm:$0xff]  }
   0x5   :  { %646 = vmatprep.mubr.bf16.mxu0 %v691_v5  ;;  %612 = vmatprep.subr.bf16.mxu1 %v693_v6  ;;  %v700_v12 = vld [vmem:[%s866_s1 + $0x60] sm:$0xff]   ;;  %v689_v13 = vld [vmem:[%s866_s1 + $0x38] sm:$0xff]   ;;  %v702_v14 = vld [vmem:[%s866_s1 + $0x68] sm:$0xff]  }
   0x6   :  { %v707_v15 = vld [vmem:[%s867_s0 + $0x10] sm:$0xff]   ;;  %v692_v16 = vld [vmem:[%s866_s1 + $0x80] sm:$0xff]   ;;  %v694_v18 = vld [vmem:[%s867_s0 + $0x8] sm:$0xff]  }
   0x7   :  { %633 = vmatpush3.bf16.msra.mxu0 %v683_v1  ;;  %v704_v17 = vld [vmem:[%s866_s1 + $0x70] sm:$0xff]   ;;  %626 = vmatprep.mubr.bf16.mxu1 %v707_v15  ;;  %v695_v19 = vld [vmem:[%s866_s1 + $0x88] sm:$0xff]   ;;  %v706_v20 = vld [vmem:[%s866_s1 + $0x78] sm:$0xff]  }
   0x8   :  { %634 = vmatprep.subr.bf16.mxu0 %v684_v2  ;;  %613 = vmatpush3.bf16.msra.mxu1 %v693_v6  ;;  %v710_v21 = vld [vmem:[%s867_s0 + $0x20] sm:$0xff]   ;;  %v697_v22 = vld [vmem:[%s866_s1 + $0x90] sm:$0xff]   ;;  %v709_v23 = vld [vmem:[%s867_s0 + $0x18] sm:$0xff]  }
   0x9   :  { %614 = vmatprep.subr.bf16.mxu1 %v696_v8  ;;  %v699_v24 = vld [vmem:[%s866_s1 + $0x98] sm:$0xff]   ;;  %v701_v25 = vld [vmem:[%s866_s1 + $0xa0] sm:$0xff]   ;;  %v703_v26 = vld [vmem:[%s866_s1 + $0xa8] sm:$0xff]  }
   0xa   :  { %v705_v27 = vld [vmem:[%s866_s1 + $0xb0] sm:$0xff]   ;;  %v708_v28 = vld [vmem:[%s866_s1 + $0xb8] sm:$0xff]   ;;  %v711_v29 = vld [vmem:[%s867_s0 + $0x28] sm:$0xff]   ;;  %s714_s0 = smov 8   ;;  %s715_s1 = smov 16  }
   0xb   :  { %635 = vmatpush3.bf16.msra.mxu0 %v684_v2 }
   0xc   :  { %636 = vmatprep.subr.bf16.mxu0 %v685_v3  ;;  %615 = vmatpush3.bf16.msra.mxu1 %v696_v8 }
   0xd   :  { %616 = vmatprep.subr.bf16.mxu1 %v698_v10 }
   0xf   :  { %637 = vmatpush3.bf16.msra.mxu0 %v685_v3 }
  0x10   :  { %638 = vmatprep.subr.bf16.mxu0 %v686_v7  ;;  %617 = vmatpush3.bf16.msra.mxu1 %v698_v10 }
  0x11   :  { %618 = vmatprep.subr.bf16.mxu1 %v700_v12 }
  0x13   :  { %639 = vmatpush3.bf16.msra.mxu0 %v686_v7 }
  0x14   :  { %640 = vmatprep.subr.bf16.mxu0 %v687_v9  ;;  %619 = vmatpush3.bf16.msra.mxu1 %v700_v12 }
  0x15   :  { %620 = vmatprep.subr.bf16.mxu1 %v702_v14 }
  0x17   :  { %641 = vmatpush3.bf16.msra.mxu0 %v687_v9 }
  0x18   :  { %642 = vmatprep.subr.bf16.mxu0 %v688_v11  ;;  %621 = vmatpush3.bf16.msra.mxu1 %v702_v14 }
  0x19   :  { %622 = vmatprep.subr.bf16.mxu1 %v704_v17 }
  0x1b   :  { %643 = vmatpush3.bf16.msra.mxu0 %v688_v11 }
  0x1c   :  { %644 = vmatprep.subr.bf16.mxu0 %v689_v13  ;;  %623 = vmatpush3.bf16.msra.mxu1 %v704_v17 }
  0x1d   :  { %624 = vmatprep.subr.bf16.mxu1 %v706_v20 }
  0x1f   :  { %645 = vmatpush3.bf16.msra.mxu0 %v689_v13 }
  0x20   :  { %650 = vmatprep.subr.bf16.mxu0 %v692_v16  ;;  %625 = vmatpush3.bf16.msra.mxu1 %v706_v20 }
  0x22   :  { %647 = vmatmul.mubr.bf16.vlgmr.msra.gmra.mrb[0].mxu0 %v694_v18 }
  0x23   :  { %651 = vmatpush3.bf16.msra.mxu0 %v692_v16  ;;  %666 = vmatprep.mubr.bf16.mxu0 %v710_v21  ;;  %v467_v21 = vlaneseq }
  0x24   :  { %652 = vmatprep.subr.bf16.mxu0 %v695_v19  ;;  %627 = vmatmul.mubr.bf16.vlgmr.msra.gmra.mrb[0].mxu1 %v709_v23  ;;  %v460_v23 = vld [vmem:[%s868_s2] sm:$0x1] }
  0x27   :  { %653 = vmatpush3.bf16.msra.mxu0 %v695_v19 }
  0x28   :  { %654 = vmatprep.subr.bf16.mxu0 %v697_v22 }
  0x2b   :  { %655 = vmatpush3.bf16.msra.mxu0 %v697_v22  ;;  %v468_v22 = vshrl.u32 %v467_v21, 7 }
  0x2c   :  { %656 = vmatprep.subr.bf16.mxu0 %v699_v24 }
  0x2f   :  { %657 = vmatpush3.bf16.msra.mxu0 %v699_v24  ;;  %v469_v24 = vsub.s32 0, %v468_v22 }
  0x30   :  { %658 = vmatprep.subr.bf16.mxu0 %v701_v25 }
  0x33   :  { %659 = vmatpush3.bf16.msra.mxu0 %v701_v25 }
  0x34   :  { %660 = vmatprep.subr.bf16.mxu0 %v703_v26 }
  0x37   :  { %661 = vmatpush3.bf16.msra.mxu0 %v703_v26 }
  0x38   :  { %662 = vmatprep.subr.bf16.mxu0 %v705_v27 }
  0x3b   :  { %663 = vmatpush3.bf16.msra.mxu0 %v705_v27  ;;  %v464_v27 = vld [vmem:[%s868_s2 + $0x1] sm:$0x1] }
  0x3c   :  { %664 = vmatprep.subr.bf16.mxu0 %v708_v28 }
  0x3f   :  { %665 = vmatpush3.bf16.msra.mxu0 %v708_v28 }
  0x42   :  { %667 = vmatmul.mubr.bf16.vlgmr.msra.gmra.mrb[0].mxu0 %v711_v29 }
  0xf7   :  { %v628_v30 = vpop.f32.mrb[0].mxu1 }
  0xf8   :  { %v151_v31 = vpop.f32.mrb[1].mxu1 }
  0xf9   :  { %v629_v32 = vpop.f32.mrb[2].mxu1 }
  0xfa   :  { %v154_v33 = vpop.f32.mrb[3].mxu1 }
 0x115   :  { %v668_v34 = vpop.f32.mrb[0].mxu0 }
 0x116   :  { %v828_v35 = vadd.f32 %v668_v34, %v628_v30  ;;  %v391_v36 = vpop.f32.mrb[1].mxu0 }
 0x117   :  { %v830_v37 = vadd.f32 %v391_v36, %v151_v31  ;;  %v669_v38 = vpop.f32.mrb[2].mxu0 }
 0x118   :  { %v832_v39 = vadd.f32 %v669_v38, %v629_v32  ;;  %v394_v40 = vpop.f32.mrb[3].mxu0  ;;  %v415_v45 = vmul.f32 %v828_v35, %v828_v35 }
 0x119   :  { %v834_v41 = vadd.f32 %v394_v40, %v154_v33  ;;  %v410_v42 = vmul.f32 %v830_v37, %v830_v37 }
 0x11a   :  { %v418_v50 = vmul.f32 %v832_v39, %v832_v39 }
 0x11b   :  { %v411_v43 = vadd.f32 %v834_v41, %v830_v37  ;;  %v412_v44 = vmul.f32 %v834_v41, %v834_v41 }
 0x11d   :  { %v413_v46 = vadd.f32 %v412_v44, %v410_v42  ;;  %v414_v47 = vadd.f32 %v828_v35, %v411_v43 }
 0x11f   :  { %v417_v48 = vadd.f32 %v832_v39, %v414_v47  ;;  %v416_v49 = vadd.f32 %v415_v45, %v413_v46 }
 0x121   :  { %420 = vrot.lane.b32.xlu0 %v417_v48, %s714_s0  ;;  %v419_v51 = vadd.f32 %v418_v50, %v416_v49 }
 0x125   :  { %423 = vrot.lane.b32.xlu0 %v419_v51, %s714_s0 }
 0x193   :  { %v421_v52 = vpop.permute.xlu0 %420 }
 0x194   :  { %v422_v53 = vadd.f32 %v421_v52, %v417_v48 }
 0x196   :  { %426 = vrot.lane.b32.xlu1 %v422_v53, %s715_s1 }
 0x197   :  { %v424_v54 = vpop.permute.xlu0 %423 }
 0x198   :  { %v425_v55 = vadd.f32 %v424_v54, %v419_v51 }
 0x19a   :  { %429 = vrot.lane.b32.xlu1 %v425_v55, %s715_s1 }
 0x208   :  { %v427_v56 = vpop.permute.xlu1 %426 }
 0x209   :  { %v428_v57 = vadd.f32 %v427_v56, %v422_v53 }
 0x20b   :  { %432 = vrot.lane.b32.xlu0 %v428_v57, %s716_s18 }
 0x20c   :  { %v430_v58 = vpop.permute.xlu1 %429 }
 0x20d   :  { %v431_v59 = vadd.f32 %v430_v58, %v425_v55 }
 0x20f   :  { %435 = vrot.lane.b32.xlu1 %v431_v59, %s716_s18 }
 0x27d   :  { %v433_v60 = vpop.permute.xlu0 %432 }
 0x27e   :  { %v434_v61 = vadd.f32 %v433_v60, %v428_v57 }
 0x280   :  { %438 = vrot.lane.b32.xlu0 %v434_v61, %s717_s19 }
 0x281   :  { %v436_v62 = vpop.permute.xlu1 %435 }
 0x282   :  { %v437_v63 = vadd.f32 %v436_v62, %v431_v59 }
 0x284   :  { %441 = vrot.lane.b32.xlu1 %v437_v63, %s717_s19 }
 0x2f2   :  { %v439_v0 = vpop.permute.xlu0 %438 }
 0x2f3   :  { %v440_v1 = vadd.f32 %v439_v0, %v434_v61 }
 0x2f5   :  { %v444_v2 = vrot.slane %v440_v1, 4 }
 0x2f6   :  { %v442_v3 = vpop.permute.xlu1 %441 }
 0x2f7   :  { %v445_v4 = vadd.f32 %v444_v2, %v440_v1  ;;  %v443_v5 = vadd.f32 %v442_v3, %v437_v63 }
 0x2f9   :  { %v446_v6 = vrot.slane %v445_v4, 2  ;;  %v450_v7 = vrot.slane %v443_v5, 4 }
 0x2fb   :  { %v447_v8 = vadd.f32 %v446_v6, %v445_v4  ;;  %v451_v9 = vadd.f32 %v450_v7, %v443_v5 }
 0x2fd   :  { %v448_v10 = vrot.slane %v447_v8, 1  ;;  %v452_v11 = vrot.slane %v451_v9, 2 }
 0x2ff   :  { %v449_v12 = vadd.f32 %v448_v10, %v447_v8  ;;  %v453_v13 = vadd.f32 %v452_v11, %v451_v9 }
 0x301   :  { %v456_v14 = vmul.f32 0.001953125, %v449_v12  ;;  %v454_v15 = vrot.slane %v453_v13, 1 }
 0x303   :  { %v455_v16 = vadd.f32 %v454_v15, %v453_v13  ;;  %v458_v17 = vmul.f32 %v456_v14, %v456_v14 }
 0x305   :  { %v457_v18 = vmul.f32 0.001953125, %v455_v16 }
 0x307   :  { %v459_v19 = vsub.f32 %v457_v18, %v458_v17 }
 0x309   :  { %v461_v20 = vadd.f32 1e-05, %v459_v19 }
 0x30b   :  { %712 = vrsqrt.f32 %v461_v20 }
 0x315   :  { %v713_v25 = vpop.eup %712 }
 0x316   :  { %v463_v26 = vmul.f32 %v713_v25, %v460_v23 }
 0x318   :  { %v465_v28 = vmul.f32 %v463_v26, %v456_v14  ;;  %v470_v29 = vrot.slane %v463_v26, %v469_v24 }
 0x31a   :  { %v466_v30 = vsub.f32 %v464_v27, %v465_v28  ;;  %v472_v31 = vmul.f32 %v834_v41, %v470_v29  ;;  %v474_v32 = vmul.f32 %v832_v39, %v470_v29  ;;  %v471_v34 = vmul.f32 %v830_v37, %v470_v29 }
 0x31b   :  { %v473_v36 = vmul.f32 %v828_v35, %v470_v29 }
 0x31c   :  { %v478_v33 = vrot.slane %v466_v30, %v469_v24 }
 0x31e   :  { %v480_v38 = vadd.f32 %v478_v33, %v472_v31  ;;  %v482_v40 = vadd.f32 %v478_v33, %v474_v32  ;;  %v479_v42 = vadd.f32 %v478_v33, %v471_v34  ;;  %v481_v43 = vadd.f32 %v478_v33, %v473_v36 }
 0x320   :  { %v484_v44 = vmax.f32 %v480_v38, 0.0  ;;  %v486_v45 = vmax.f32 %v482_v40, 0.0  ;;  %v483_v46 = vmax.f32 %v479_v42, 0.0  ;;  %v485_v47 = vmax.f32 %v481_v43, 0.0 }
 0x322   :  { %v488_v48 = vmax.f32 %v484_v44, %v486_v45  ;;  %v487_v49 = vmax.f32 %v483_v46, %v485_v47 }
 0x324   :  { %493 = vrot.lane.b32.xlu0 %v488_v48, %s717_s19  ;;  %491 = vrot.lane.b32.xlu1 %v487_v49, %s717_s19 }
 0x396   :  { %v494_v39 = vpop.permute.xlu0 %493  ;;  %v492_v37 = vpop.permute.xlu1 %491 }
 0x397   :  { %v498_v41 = vmax.f32 %v488_v48, %v494_v39  ;;  %v497_v35 = vmax.f32 %v487_v49, %v492_v37 }
 0x399   :  { %500 = vrot.lane.b32.xlu0 %v498_v41, %s717_s19 }
 0x40b   :  { %v501_v50 = vpop.permute.xlu0 %500 }
 0x40c   :  { %v504_v51 = vsel %vm503_vm0, %v497_v35, %v501_v50 }
 0x40d   :  { %505 = vst [vmem:[%s869_s3] sm:$0xff] %v504_v51 }

</bundles_post_ra>
